<compile_context>
chip_gen: v7x
topology: tpu7x:2x2x1
jax: 0.10.0
libtpu: 0.0.40
codegen_flags: <defaults>
</compile_context>

<pallas_src>
import functools

import jax
import jax.numpy as jnp
from jax import lax
from jax.experimental import pallas as pl
from jax.experimental.pallas import tpu as pltpu


# ---------------------------------------------------------------------------
# Wrapper-side (init-time) preprocessing, mirroring the PyTorch __init__ and
# getTransformedEmbeddingMatrix().
# ---------------------------------------------------------------------------

def preprocess_embeddings(vectors,
                          length_normalization=True,
                          mean_centering=True,
                          second_length_normalization=True,
                          eps=1e-12):
    """L2 norm -> mean-center -> L2 norm (eps guards all-zero rows)."""
    w = vectors.astype(jnp.float32)
    if length_normalization:
        w = w / jnp.maximum(jnp.linalg.norm(w, axis=1, keepdims=True), eps)
    if mean_centering:
        w = w - jnp.mean(w, axis=0)
    if second_length_normalization:
        w = w / jnp.maximum(jnp.linalg.norm(w, axis=1, keepdims=True), eps)
    return w


def collapse_matrices(matrices, embedding_dim, max_matrix_idx=None):
    """M = M0 @ M1 @ ... (optionally truncated at max_matrix_idx), in f32."""
    if max_matrix_idx is not None:
        matrices = matrices[: max_matrix_idx + 1]
    result = jnp.eye(embedding_dim, dtype=jnp.float32)
    for m in matrices:
        result = result @ m.astype(jnp.float32)
    return result


def fold_transform_into_table(emb_f32, matrices, max_matrix_idx=None,
                              dtype=jnp.bfloat16):
    """E @ (M0 @ M1 @ ...): same value as module.getTransformedEmbeddingMatrix().

    The fold is a benign reassociation of the f32 sequential chain; the final
    cast (e.g. to bf16) is the only extra rounding vs. PyTorch.
    """
    D = emb_f32.shape[1]
    m = collapse_matrices(matrices, D, max_matrix_idx)
    return (emb_f32 @ m).astype(dtype)


# ---------------------------------------------------------------------------
# Kernels
# ---------------------------------------------------------------------------

def _onehot_gather_kernel(ids_ref, table_ref, out_ref):
    """Small-vocab path: one-hot MXU gather of the pre-transformed table.

    ids_ref   : VMEM (TS, 1) int32
    table_ref : VMEM (V, D)  bf16/f32   pre-transformed table (constant block)
    out_ref   : VMEM (TS, D) table dtype
    """
    ts = out_ref.shape[0]
    v = table_ref.shape[0]
    ids_col = ids_ref[...]                                       # (TS, 1) i32
    vocab_iota = lax.broadcasted_iota(jnp.int32, (ts, v), 1)     # (TS, V) i32
    onehot = (vocab_iota == ids_col).astype(table_ref.dtype)     # single cast
    # Exact gather: 0/1 weights, f32 accumulation on the MXU.
    out_ref[...] = jnp.dot(onehot, table_ref[...],
                           preferred_element_type=jnp.float32
                           ).astype(out_ref.dtype)


def _row_gather_kernel(ids_smem_ref, table_ref, out_ref):
    """Large-vocab path: SMEM-indexed row gather, O(TS * D).

    ids_smem_ref : SMEM (S_pad,) int32  (scalar prefetch)
    table_ref    : VMEM (V, D) f32      pre-transformed table (constant block)
    out_ref      : VMEM (TS, D) f32
    """
    ts = out_ref.shape[0]
    base = pl.program_id(0) * ts
    # Fully unrolled: destination rows are static (cheap aligned stores), only
    # the source row index is dynamic.  Iterations are independent -> ILP.
    for r in range(ts):
        idx = ids_smem_ref[base + r]
        out_ref[pl.ds(r, 1), :] = table_ref[pl.ds(idx, 1), :]


# ---------------------------------------------------------------------------
# Wrapper
# ---------------------------------------------------------------------------

def _vmem_capacity_bytes():
    try:
        return int(pltpu.get_tpu_info().vmem_capacity_bytes)
    except Exception:
        return 64 << 20  # v7x per-TC VMEM: safe lower bound across v5e/v6e/v7x


def _clamp_vmem_limit(need_bytes):
    cap = _vmem_capacity_bytes()
    return int(min(max(need_bytes, 32 << 20), cap - (2 << 20)))


@functools.partial(jax.jit, static_argnames=("tile_s", "vocab_onehot_max"))
def transformed_embeddings_forward(token_ids, transformed_table, *,
                                   tile_s=256, vocab_onehot_max=1024):
    """token_ids: (S,) int; transformed_table: (V, D) = E @ M0 @ M1 @ ...

    Returns (S, D) in transformed_table.dtype (f32 on the large-vocab path).
    tile_s: 256 fills the 256-wide MXU on v6e/v7x; 128 is fine on v5e.
    """
    S = token_ids.shape[0]
    V, D = transformed_table.shape
    assert tile_s % 8 == 0, "tile_s must be a multiple of 8"

    n_tiles = pl.cdiv(S, tile_s)
    s_pad = n_tiles * tile_s

    # Clip (guards against OOB ids; note: silently remaps bad ids) and pad.
    ids = jnp.clip(token_ids.astype(jnp.int32), 0, V - 1)
    ids = jnp.pad(ids, (0, s_pad - S))

    if V <= vocab_onehot_max:
        # ---- One-hot MXU gather (small vocabulary) ----------------------
        table = transformed_table
        out_dtype = table.dtype
        tbytes = jnp.dtype(table.dtype).itemsize
        vmem_need = (
            2 * V * D * tbytes              # table (double-buffered by default)
            + 2 * tile_s * 128 * 4          # ids (TS,1) block is lane-padded
            + 2 * tile_s * D * tbytes       # output tiles
            + tile_s * V * (tbytes + 4)     # in-kernel iota + one-hot temps
            + (4 << 20)                     # headroom
        )
        # TODO(synk): single-buffer the constant table block
        # (pipeline_mode=pl.Buffered(1)) when vocab size approaches the VMEM
        # limit; its block index never changes, so the 2nd buffer is waste.
        out = pl.pallas_call(
            _onehot_gather_kernel,
            out_shape=jax.ShapeDtypeStruct((s_pad, D), out_dtype),
            grid_spec=pltpu.PrefetchScalarGridSpec(
                num_scalar_prefetch=0,
                grid=(n_tiles,),
                in_specs=[
                    pl.BlockSpec((tile_s, 1), lambda i: (i, 0)),   # ids
                    pl.BlockSpec((V, D), lambda i: (0, 0)),        # table
                ],
                out_specs=pl.BlockSpec((tile_s, D), lambda i: (i, 0)),
            ),
            compiler_params=pltpu.CompilerParams(
                dimension_semantics=("parallel",),   # tiles independent (v7x 2 TCs)
                vmem_limit_bytes=_clamp_vmem_limit(vmem_need),
            ),
        )(ids[:, None], table)
    else:
        # ---- SMEM scalar-prefetch row gather (larger vocabulary) --------
        # f32 rows are exactly one sublane, keeping dynamic row addressing on
        # the well-supported 32-bit path.
        table = transformed_table.astype(jnp.float32)
        out_dtype = jnp.float32
        vmem_need = 2 * V * D * 4 + 2 * tile_s * D * 4 + (4 << 20)
        out = pl.pallas_call(
            _row_gather_kernel,
            out_shape=jax.ShapeDtypeStruct((s_pad, D), out_dtype),
            grid_spec=pltpu.PrefetchScalarGridSpec(
                num_scalar_prefetch=1,           # ids -> SMEM
                grid=(n_tiles,),
                in_specs=[pl.BlockSpec((V, D), lambda i, ids_ref: (0, 0))],
                out_specs=pl.BlockSpec((tile_s, D), lambda i, ids_ref: (i, 0)),
            ),
            compiler_params=pltpu.CompilerParams(
                dimension_semantics=("parallel",),
                vmem_limit_bytes=_clamp_vmem_limit(vmem_need),
            ),
        )(ids, table)

    return out[:S]


# ---------------------------------------------------------------------------
# Demo / self-test
# ---------------------------------------------------------------------------

if __name__ == "__main__":
    key = jax.random.PRNGKey(0)

    # ---- Config A: small vocab -> one-hot MXU gather, bf16 table/output ----
    V, D, S, NM = 64, 128, 200, 2
    k_vec, k_mat, k_ids, key = jax.random.split(key, 4)
    raw_vectors = jax.random.normal(k_vec, (V, D), dtype=jnp.float32)
    matrices = jax.random.normal(k_mat, (NM, D, D), dtype=jnp.float32) * 0.1
    token_ids = jax.random.randint(k_ids, (S,), 0, V, dtype=jnp.int32)

    emb_f32 = preprocess_embeddings(raw_vectors)
    # Init-time fold of the full chain (maxMatrixName=None), f32 then bf16.
    table_a = fold_transform_into_table(emb_f32, list(matrices),
                                        max_matrix_idx=None, dtype=jnp.bfloat16)

    # tile_s=128 here only to exercise a 2-step grid at S=200 (also the v5e
    # preference); the production default is 256 for v6e/v7x.
    out_a = jax.block_until_ready(
        transformed_embeddings_forward(token_ids, table_a, tile_s=128))

    ref_a = emb_f32[token_ids]
    for m in range(NM):
        ref_a = ref_a @ matrices[m]
    assert out_a.shape == (S, D)
    assert bool(jnp.all(jnp.isfinite(out_a.astype(jnp.float32))))
    assert jnp.allclose(out_a.astype(jnp.float32), ref_a, atol=3e-2, rtol=3e-2), \
        "one-hot path mismatch vs reference"

    # ---- Config B: larger vocab -> SMEM scalar-prefetch row gather, f32 ----
    # Also exercises the maxMatrixName truncation (idx <= maxMatrixIdx = 1).
    V2, D2, S2, NM2 = 2048, 128, 384, 3
    k_vec2, k_mat2, k_ids2, key = jax.random.split(key, 4)
    raw_vectors2 = jax.random.normal(k_vec2, (V2, D2), dtype=jnp.float32)
    matrices2 = jax.random.normal(k_mat2, (NM2, D2, D2), dtype=jnp.float32) * 0.05
    token_ids2 = jax.random.randint(k_ids2, (S2,), 0, V2, dtype=jnp.int32)

    emb2_f32 = preprocess_embeddings(raw_vectors2)
    table_b = fold_transform_into_table(emb2_f32, list(matrices2),
                                        max_matrix_idx=1, dtype=jnp.float32)

    out_b = jax.block_until_ready(
        transformed_embeddings_forward(token_ids2, table_b, tile_s=128))

    ref_b = emb2_f32[token_ids2]
    for m in range(2):                      # idx <= maxMatrixIdx == 1
        ref_b = ref_b @ matrices2[m]
    assert out_b.shape == (S2, D2)
    assert bool(jnp.all(jnp.isfinite(out_b)))
    assert jnp.allclose(out_b, ref_b, atol=2e-3, rtol=2e-3), \
        "row-gather path mismatch vs reference"

    print("KERNEL_OK")
</pallas_src>

<mosaic_0001>
module attributes {stable_mosaic.version = 11 : i64} {
  func.func @_onehot_gather_kernel(%arg0: i32, %arg1: memref<128x1xi32, #tpu.memory_space<vmem>>, %arg2: memref<64x128xbf16, #tpu.memory_space<vmem>>, %arg3: memref<128x128xbf16, #tpu.memory_space<vmem>>) attributes {dimension_semantics = [#tpu.dimension_semantics<parallel>], iteration_bounds = array<i64: 2>, scalar_prefetch = 0 : i64, scratch_operands = 0 : i64, tpu.core_type = #tpu.core_type<tc>, window_params = [{transform_indices = @transform_0, window_bounds = array<i64: 128, 1>}, {pipeline_mode = #tpu.pipeline_mode<synchronous>, transform_indices = @transform_1, window_bounds = array<i64: 64, 128>}, {transform_indices = @transform_2, window_bounds = array<i64: 128, 128>}]} {
    %c0 = arith.constant 0 : index
    %c0_0 = arith.constant 0 : index
    %0 = vector.load %arg1[%c0, %c0_0] : memref<128x1xi32, #tpu.memory_space<vmem>>, vector<128x1xi32>
    %1 = tpu.iota {dimensions = array<i32: 1>} : vector<128x64xi32>
    %2 = vector.broadcast %0 : vector<128x1xi32> to vector<128x64xi32>
    %3 = arith.cmpi eq, %1, %2 : vector<128x64xi32>
    %4 = arith.extui %3 : vector<128x64xi1> to vector<128x64xi32>
    %5 = arith.sitofp %4 : vector<128x64xi32> to vector<128x64xf32>
    %6 = arith.truncf %5 : vector<128x64xf32> to vector<128x64xbf16>
    %c0_1 = arith.constant 0 : index
    %c0_2 = arith.constant 0 : index
    %7 = vector.load %arg2[%c0_1, %c0_2] : memref<64x128xbf16, #tpu.memory_space<vmem>>, vector<64x128xbf16>
    %cst = arith.constant dense<0.000000e+00> : vector<128x128xf32>
    %8 = tpu.matmul %6, %7, %cst {dimension_numbers = #tpu.dot_dimension_numbers<[1], [0], [0], [1], [0, 0, 1, 1], [], []>} : vector<128x64xbf16>, vector<64x128xbf16>, vector<128x128xf32> -> vector<128x128xf32>
    %9 = arith.truncf %8 : vector<128x128xf32> to vector<128x128xbf16>
    %c0_3 = arith.constant 0 : index
    %c0_4 = arith.constant 0 : index
    %10 = vector.load %arg3[%c0_3, %c0_4] : memref<128x128xbf16, #tpu.memory_space<vmem>>, vector<128x128xbf16>
    tpu.vector_store %arg3[%c0_3, %c0_4], %9 {strides = array<i32>} : memref<128x128xbf16, #tpu.memory_space<vmem>>, vector<128x128xbf16>,
    return
  }
  func.func @transform_0(%arg0: i32) -> (i32, i32) {
    %c0_i32 = arith.constant 0 : i32
    %c0_i32_0 = arith.constant 0 : i32
    return %arg0, %c0_i32 : i32, i32
  }
  func.func @transform_1(%arg0: i32) -> (i32, i32) {
    %c0_i32 = arith.constant 0 : i32
    %c0_i32_0 = arith.constant 0 : i32
    %c0_i32_1 = arith.constant 0 : i32
    return %c0_i32, %c0_i32_0 : i32, i32
  }
  func.func @transform_2(%arg0: i32) -> (i32, i32) {
    %c0_i32 = arith.constant 0 : i32
    %c0_i32_0 = arith.constant 0 : i32
    return %arg0, %c0_i32 : i32, i32
  }
}

</mosaic_0001>

<bundles_post_ra>
// kernel: transformed_embeddings_forward.1
= control target key start
LH: loop header
LB: loop body
LE: loop exit
PB: predicated region body
PF: predicated region fallthrough
CT: control target
= control target key end

     0   :  { %s763_s9 = smov 0   ;;  %s840_s0 = inlined_call_operand.vmem [shape: s32[256,1], index: 0, kind: input, shape index: {}]   ;;  %s841_s1 = inlined_call_operand.vmem [shape: bf16[64,128], index: 1, kind: input, shape index: {}]   ;;  %s842_s2 = inlined_call_operand.vmem [shape: bf16[256,128], index: 2, kind: output, shape index: {}]  }
   0x1 LB: > { %s560_s10 = sadd.s32 4294967295, %s744_s9   ;;  %p564_p0 = scmp.ge.s32.totalorder %s744_s9, 1  ;;  %s744_s9 = sphi %s763_s9, %s12_s9  }
   0x2   : > { %p113_p1 = scmp.lt.s32.totalorder %s744_s9, 3 }
   0x4   : > { %p114_p2 = pnand %p564_p0, %p113_p1 }
   0x5   : > { %s565_s11 = sshll.u32 (!%p114_p2), %s560_s10, 4  ;;  %v746_v0 = vmov (!%p114_p2), 0   ;;  %v734_v1 = vld [vmem:[%s841_s1] sm:$0xff] (!%p114_p2)   ;;  %v735_v2 = vld [vmem:[%s841_s1 + $0x8] sm:$0xff] (!%p114_p2)   ;;  %v736_v7 = vld [vmem:[%s841_s1 + $0x10] sm:$0xff] (!%p114_p2)   ;;  %v164_v21 = vlaneseq (!%p114_p2)  ;;  %vm302_vm4 = vcmask (!%p114_p2), 523264  }
   0x6   : > { %117 = sbr.rel (%p114_p2) target bundleno = 396 (0x18c), region = 28  ;;  %733 = vset.pattern.permute.xlu1 (!%p114_p2), %v746_v0  ;;  %732 = vset.pattern.permute.xlu0 (!%p114_p2), %v746_v0  ;;  %p136_p3 = scmp.lt.s32.totalorder (!%p114_p2), %s565_s11, 31  ;;  %v737_v10 = vld [vmem:[%s841_s1 + $0x18] sm:$0xff] (!%p114_p2)   ;;  %v747_v27 = vmov (!%p114_p2), 0.0  }
   0x7   : > { %690 = vmatprep.subr.bf16.mxu0 (!%p114_p2), %v734_v1  ;;  %714 = vmatprep.subr.bf16.mxu1 (!%p114_p2), %v734_v1  ;;  %v807_v22 = vand.u32 (!%p114_p2), 127, %v164_v21 }
   0x8   : > { %691 = vmatpush3.bf16.msra.mxu0 (!%p114_p2), %v734_v1  ;;  %718 = vmatpush3.bf16.msra.mxu1 (!%p114_p2), %v734_v1 }
   0x9   : > { %692 = vmatprep.subr.bf16.mxu0 (!%p114_p2), %v735_v2  ;;  %715 = vmatprep.subr.bf16.mxu1 (!%p114_p2), %v735_v2 }
   0xc   : > { %693 = vmatpush3.bf16.msra.mxu0 (!%p114_p2), %v735_v2  ;;  %719 = vmatpush3.bf16.msra.mxu1 (!%p114_p2), %v735_v2 }
   0xd   : > { %s844_s11 = smov (!%p136_p3, %s565_s11), 31  ;;  %694 = vmatprep.subr.bf16.mxu0 %v736_v7  ;;  %716 = vmatprep.subr.bf16.mxu1 %v736_v7 }
   0xe   : > { %s566_s14 = sshll.u32 %s844_s11, 3  ;;  %s568_s24 = sshll.u32 %s844_s11, 2 }
   0xf   : > { %s780_s17 = scalar_lea.vmem %s840_s0, %s566_s14  ;;  %s145_s27 = scalar_lea.vmem %s842_s2, %s568_s24 }
  0x10   : > { %v156_v3 = vld [vmem:[%s780_s17 + $0x40] sm:$0xff]  ;;  %v157_v5 = vld [vmem:[%s780_s17 + $0x48] sm:$0xff]  ;;  %v151_v8 = vld [vmem:[%s780_s17 + $0x18] sm:$0xff]  ;;  %695 = vmatpush3.bf16.msra.mxu0 %v736_v7  ;;  %720 = vmatpush3.bf16.msra.mxu1 %v736_v7 }
  0x11   : > { %v148_v4 = vld [vmem:[%s780_s17] sm:$0xff]  ;;  %191 = vperm.xlu1 %733, %v156_v3   ;;  %v149_v6 = vld [vmem:[%s780_s17 + $0x8] sm:$0xff]  ;;  %v150_v9 = vld [vmem:[%s780_s17 + $0x10] sm:$0xff]  ;;  %696 = vmatprep.subr.bf16.mxu0 %v737_v10 }
  0x12   : > { %167 = vperm.xlu0 %732, %v148_v4   ;;  %v159_v11 = vld [vmem:[%s780_s17 + $0x58] sm:$0xff]  ;;  %v158_v12 = vld [vmem:[%s780_s17 + $0x50] sm:$0xff]  ;;  %717 = vmatprep.subr.bf16.mxu1 %v737_v10  ;;  %v153_v13 = vld [vmem:[%s780_s17 + $0x28] sm:$0xff] }
  0x13   : > { %v152_v14 = vld [vmem:[%s780_s17 + $0x20] sm:$0xff]  ;;  %v161_v15 = vld [vmem:[%s780_s17 + $0x68] sm:$0xff]  ;;  %v155_v17 = vld [vmem:[%s780_s17 + $0x38] sm:$0xff] }
  0x14   : > { %697 = vmatpush3.bf16.msra.mxu0 %v737_v10  ;;  %721 = vmatpush3.bf16.msra.mxu1 %v737_v10  ;;  %v160_v16 = vld [vmem:[%s780_s17 + $0x60] sm:$0xff]  ;;  %v154_v18 = vld [vmem:[%s780_s17 + $0x30] sm:$0xff]  ;;  %v163_v19 = vld [vmem:[%s780_s17 + $0x78] sm:$0xff] }
  0x15   : > { %194 = vperm.xlu1 %733, %v157_v5   ;;  %v162_v20 = vld [vmem:[%s780_s17 + $0x70] sm:$0xff] }
  0x16   : > { %170 = vperm.xlu0 %732, %v149_v6  }
  0x19   : > { %176 = vperm.xlu1 %733, %v151_v8  }
  0x1a   : > { %173 = vperm.xlu0 %732, %v150_v9  }
  0x1d   : > { %200 = vperm.xlu1 %733, %v159_v11  }
  0x1e   : > { %197 = vperm.xlu0 %732, %v158_v12  }
  0x21   : > { %182 = vperm.xlu1 %733, %v153_v13  }
  0x22   : > { %179 = vperm.xlu0 %732, %v152_v14  }
  0x25   : > { %206 = vperm.xlu1 %733, %v161_v15  }
  0x26   : > { %203 = vperm.xlu0 %732, %v160_v16  }
  0x29   : > { %188 = vperm.xlu1 %733, %v155_v17  }
  0x2a   : > { %185 = vperm.xlu0 %732, %v154_v18  }
  0x2d   : > { %212 = vperm.xlu1 %733, %v163_v19  }
  0x2e   : > { %209 = vperm.xlu0 %732, %v162_v20  }
  0x90   : > { %v192_v23 = vpop.permute.xlu1 %191 }
  0x91   : > { %v168_v24 = vpop.permute.xlu0 %167  ;;  %vm222_vm0 = vcmp.eq.s32.totalorder %v807_v22, %v192_v23 }
  0x92   : > { %vm214_vm1 = vcmp.eq.s32.totalorder %v807_v22, %v168_v24  ;;  %v577_v28 = vsel %vm222_vm0, 1.0, %v747_v27 }
  0x93   : > { %v569_v29 = vsel %vm214_vm1, 1.0, %v747_v27 }
  0x94   : > { %v195_v25 = vpop.permute.xlu1 %194 }
  0x95   : > { %v171_v26 = vpop.permute.xlu0 %170  ;;  %vm223_vm2 = vcmp.eq.s32.totalorder %v807_v22, %v195_v25 }
  0x96   : > { %vm215_vm3 = vcmp.eq.s32.totalorder %v807_v22, %v171_v26  ;;  %v578_v30 = vsel %vm223_vm2, 1.0, %v747_v27 }
  0x97   : > { %v570_v31 = vsel %vm215_vm3, 1.0, %v747_v27  ;;  %v266_v33 = vpack.c.bf16 %v578_v30, %v577_v28 }
  0x98   : > { %v262_v32 = vpack.c.bf16 %v570_v31, %v569_v29  ;;  %v177_v34 = vpop.permute.xlu1 %176 }
  0x99   : > { %v174_v35 = vpop.permute.xlu0 %173  ;;  %vm217_vm5 = vcmp.eq.s32.totalorder %v807_v22, %v177_v34  ;;  %706 = vmatprep.mubr.msk.bf16.mxu1 %vm302_vm4, %v266_v33 }
  0x9a   : > { %vm216_vm6 = vcmp.eq.s32.totalorder %v807_v22, %v174_v35  ;;  %698 = vmatprep.mubr.msk.bf16.mxu0 %vm302_vm4, %v262_v32  ;;  %v572_v36 = vsel %vm217_vm5, 1.0, %v747_v27 }
  0x9b   : > { %v571_v37 = vsel %vm216_vm6, 1.0, %v747_v27 }
  0x9c   : > { %v263_v38 = vpack.c.bf16 %v572_v36, %v571_v37  ;;  %v201_v39 = vpop.permute.xlu1 %200 }
  0x9d   : > { %v198_v40 = vpop.permute.xlu0 %197  ;;  %vm225_vm7 = vcmp.eq.s32.totalorder %v807_v22, %v201_v39 }
  0x9e   : > { %vm224_vm8 = vcmp.eq.s32.totalorder %v807_v22, %v198_v40  ;;  %699 = vmatmul.mubr.msk.bf16.vlgmr.msra.gmra.mrb[0].mxu0 %vm302_vm4, %v263_v38  ;;  %v580_v41 = vsel %vm225_vm7, 1.0, %v747_v27 }
  0x9f   : > { %v579_v42 = vsel %vm224_vm8, 1.0, %v747_v27 }
  0xa0   : > { %v267_v43 = vpack.c.bf16 %v580_v41, %v579_v42  ;;  %v183_v44 = vpop.permute.xlu1 %182 }
  0xa1   : > { %v180_v45 = vpop.permute.xlu0 %179  ;;  %vm219_vm9 = vcmp.eq.s32.totalorder %v807_v22, %v183_v44 }
  0xa2   : > { %vm218_vm10 = vcmp.eq.s32.totalorder %v807_v22, %v180_v45  ;;  %707 = vmatmul.mubr.msk.bf16.vlgmr.msra.gmra.mrb[0].mxu1 %vm302_vm4, %v267_v43  ;;  %v574_v46 = vsel %vm219_vm9, 1.0, %v747_v27 }
  0xa3   : > { %v573_v47 = vsel %vm218_vm10, 1.0, %v747_v27 }
  0xa4   : > { %v264_v48 = vpack.c.bf16 %v574_v46, %v573_v47  ;;  %v207_v49 = vpop.permute.xlu1 %206 }
  0xa5   : > { %v204_v50 = vpop.permute.xlu0 %203  ;;  %vm227_vm11 = vcmp.eq.s32.totalorder %v807_v22, %v207_v49 }
  0xa6   : > { %vm226_vm12 = vcmp.eq.s32.totalorder %v807_v22, %v204_v50  ;;  %702 = vmatprep.mubr.msk.bf16.mxu0 %vm302_vm4, %v264_v48  ;;  %v582_v51 = vsel %vm227_vm11, 1.0, %v747_v27 }
  0xa7   : > { %v581_v52 = vsel %vm226_vm12, 1.0, %v747_v27 }
  0xa8   : > { %v268_v53 = vpack.c.bf16 %v582_v51, %v581_v52  ;;  %v189_v54 = vpop.permute.xlu1 %188 }
  0xa9   : > { %v186_v55 = vpop.permute.xlu0 %185  ;;  %vm221_vm13 = vcmp.eq.s32.totalorder %v807_v22, %v189_v54 }
  0xaa   : > { %vm220_vm14 = vcmp.eq.s32.totalorder %v807_v22, %v186_v55  ;;  %710 = vmatprep.mubr.msk.bf16.mxu1 %vm302_vm4, %v268_v53  ;;  %v576_v56 = vsel %vm221_vm13, 1.0, %v747_v27 }
  0xab   : > { %v575_v57 = vsel %vm220_vm14, 1.0, %v747_v27 }
  0xac   : > { %v265_v58 = vpack.c.bf16 %v576_v56, %v575_v57  ;;  %v213_v59 = vpop.permute.xlu1 %212 }
  0xad   : > { %v210_v60 = vpop.permute.xlu0 %209  ;;  %vm229_vm15 = vcmp.eq.s32.totalorder %v807_v22, %v213_v59 }
  0xae   : > { %vm228_vm0 = vcmp.eq.s32.totalorder %v807_v22, %v210_v60  ;;  %703 = vmatmul.mubr.msk.bf16.gmra.mrb[4].mxu0 %vm302_vm4, %v265_v58  ;;  %v584_v61 = vsel %vm229_vm15, 1.0, %v747_v27 }
  0xaf   : > { %v583_v62 = vsel %vm228_vm0, 1.0, %v747_v27 }
  0xb0   : > { %v269_v63 = vpack.c.bf16 %v584_v61, %v583_v62 }
  0xb2   : > { %711 = vmatmul.mubr.msk.bf16.gmra.mrb[4].mxu1 %vm302_vm4, %v269_v63 }
 0x171   : > { %v700_v0 = vpop.f32.mrb[0].mxu0 }
 0x172   : > { %v361_v1 = vpop.f32.mrb[1].mxu0 }
 0x173   : > { %v701_v2 = vpop.f32.mrb[2].mxu0 }
 0x174   : > { %v639_v3 = vpack.c.bf16 %v701_v2, %v700_v0  ;;  %v364_v4 = vpop.f32.mrb[3].mxu0 }
 0x175   : > { %v634_v5 = vpack.c.bf16 %v364_v4, %v361_v1  ;;  %v708_v6 = vpop.f32.mrb[0].mxu1 }
 0x176   : > { %671 = vst [vmem:[%s145_s27 + $0x8] sm:$0xff] %v639_v3   ;;  %v393_v7 = vpop.f32.mrb[1].mxu1 }
 0x177   : > { %635 = vst [vmem:[%s145_s27] sm:$0xff] %v634_v5   ;;  %v709_v8 = vpop.f32.mrb[2].mxu1 }
 0x178   : > { %v659_v9 = vpack.c.bf16 %v709_v8, %v708_v6  ;;  %v396_v10 = vpop.f32.mrb[3].mxu1 }
 0x179   : > { %v654_v11 = vpack.c.bf16 %v396_v10, %v393_v7 }
 0x17a   : > { %675 = vst [vmem:[%s145_s27 + $0x28] sm:$0xff] %v659_v9  }
 0x17b   : > { %674 = vst [vmem:[%s145_s27 + $0x20] sm:$0xff] %v654_v11  }
 0x181   : > { %v704_v12 = vpop.f32.mrb[4].mxu0 }
 0x182   : > { %v377_v13 = vpop.f32.mrb[5].mxu0 }
 0x183   : > { %v705_v14 = vpop.f32.mrb[6].mxu0 }
 0x184   : > { %v649_v15 = vpack.c.bf16 %v705_v14, %v704_v12  ;;  %v380_v16 = vpop.f32.mrb[7].mxu0 }
 0x185   : > { %v644_v17 = vpack.c.bf16 %v380_v16, %v377_v13  ;;  %v712_v18 = vpop.f32.mrb[4].mxu1 }
 0x186   : > { %673 = vst [vmem:[%s145_s27 + $0x18] sm:$0xff] %v649_v15   ;;  %v409_v19 = vpop.f32.mrb[5].mxu1 }
 0x187   : > { %672 = vst [vmem:[%s145_s27 + $0x10] sm:$0xff] %v644_v17   ;;  %v713_v20 = vpop.f32.mrb[6].mxu1 }
 0x188   : > { %v669_v21 = vpack.c.bf16 %v713_v20, %v712_v18  ;;  %v412_v22 = vpop.f32.mrb[7].mxu1 }
 0x189   : > { %v664_v23 = vpack.c.bf16 %v412_v22, %v409_v19 }
 0x18a   : > { %677 = vst [vmem:[%s145_s27 + $0x38] sm:$0xff] %v669_v21  }
 0x18b   : > { %676 = vst [vmem:[%s145_s27 + $0x30] sm:$0xff] %v664_v23  }
 0x18c PF: > { %s12_s9 = sadd.s32 1, %s744_s9  }
 0x18d   : > { %p9_p4 = scmp.ge.s32.totalorder %s12_s9, 4  }
 0x18f   :  { %11 = sbr.rel (!%p9_p4) target bundleno = 1 (0x1), region = 58 }

</bundles_post_ra>
